<compile_context>
chip_gen: v6e
topology: v6e:2x2x1
jax: 0.10.0
libtpu: 0.0.40
codegen_flags: <defaults>
</compile_context>

<pallas_src>
import jax
import jax.numpy as jnp
from jax.experimental import pallas as pl
from jax.experimental.pallas import tpu as pltpu

LANE = 128        # TPU vreg lane width: hidden / output dims padded to this
MAX_TILE_B = 256  # max batch rows per grid step (capped to avoid vreg/VMEM spill of f32 intermediates)


def actor_kernel(x_ref, w1_ref, b1_ref, w2_ref, b2_ref, w3_ref, b3_ref, o_ref):
    # fc1 + relu  -- f32 matmul (K = input_size is tiny; keeps input precision, no x cast)
    h1 = jnp.dot(x_ref[...], w1_ref[...], preferred_element_type=jnp.float32)
    h1 = jnp.maximum(h1 + b1_ref[...], 0.0)
    # fc2 + relu  -- bf16 MXU operands, f32 accumulate
    h2 = jnp.dot(h1.astype(jnp.bfloat16), w2_ref[...], preferred_element_type=jnp.float32)
    h2 = jnp.maximum(h2 + b2_ref[...], 0.0)
    # fc3 + tanh  -- bf16 MXU operands, f32 accumulate; bf16 lane-dense store
    h3 = jnp.dot(h2.astype(jnp.bfloat16), w3_ref[...], preferred_element_type=jnp.float32)
    o_ref[...] = jnp.tanh(h3 + b3_ref[...]).astype(o_ref.dtype)


def _round_up(n, m):
    return ((n + m - 1) // m) * m


def _choose_tiling(batch):
    """Pick (tile_b, batch_pad).  <=256 rows -> one step; otherwise an even number of
    <=MAX_TILE_B-row steps so v7x's two TensorCores both take grid steps."""
    b8 = _round_up(batch, 8)
    if b8 <= MAX_TILE_B:
        return b8, b8
    n_steps = pl.cdiv(b8, MAX_TILE_B)
    if n_steps % 2:
        n_steps += 1                      # even step count: one+ step per v7x TC
    tile_b = _round_up(pl.cdiv(b8, n_steps), 8)
    return tile_b, tile_b * n_steps


def pad_actor_params(params, lane=LANE):
    """One-time re-layout: zero-pad hidden/output widths to the 128-lane vreg.
    fc1 weight stays f32 (f32 first matmul); fc2/fc3 weights cast to bf16; biases f32."""
    w1, b1, w2, b2, w3, b3 = params

    def pad2(a, rows, cols, dtype):
        out = jnp.zeros((rows, cols), dtype)
        return out.at[: a.shape[0], : a.shape[1]].set(a.astype(dtype))

    in_size = w1.shape[0]
    return (
        pad2(w1, in_size, lane, jnp.float32),
        pad2(b1, 1, lane, jnp.float32),
        pad2(w2, lane, lane, jnp.bfloat16),
        pad2(b2, 1, lane, jnp.float32),
        pad2(w3, lane, lane, jnp.bfloat16),
        pad2(b3, 1, lane, jnp.float32),
    )


def actor_forward(x, padded_params, num_actions):
    """x: (batch, input_size) f32.  padded_params: output of pad_actor_params."""
    w1, b1, w2, b2, w3, b3 = padded_params
    batch, input_size = x.shape
    lane = w1.shape[1]

    tile_b, batch_pad = _choose_tiling(batch)
    if batch_pad != batch:                      # only pad when actually ragged
        x = jnp.pad(x, ((0, batch_pad - batch), (0, 0)))
    grid = (batch_pad // tile_b,)

    # Weights/biases: full-array blocks, same block every grid step -> VMEM-resident.
    full = lambda a: pl.BlockSpec(a.shape, lambda i: (0, 0))

    flops = 2 * batch_pad * (input_size * lane + lane * lane + lane * lane)
    bytes_accessed = (
        x.size * x.dtype.itemsize
        + sum(int(p.size) * p.dtype.itemsize for p in padded_params)
        + batch_pad * lane * 2                  # bf16 output writeback
    )
    cost = pl.CostEstimate(
        flops=int(flops),
        transcendentals=int(batch_pad * lane),  # tanh executed on the padded output tile
        bytes_accessed=int(bytes_accessed),
    )

    out = pl.pallas_call(
        actor_kernel,
        out_shape=jax.ShapeDtypeStruct((batch_pad, lane), jnp.bfloat16),
        grid=grid,
        in_specs=[
            pl.BlockSpec((tile_b, input_size), lambda i: (i, 0)),  # stream x over batch
            full(w1), full(b1), full(w2), full(b2), full(w3), full(b3),
        ],
        out_specs=pl.BlockSpec((tile_b, lane), lambda i: (i, 0)),  # lane-dense bf16 output
        compiler_params=pltpu.CompilerParams(
            dimension_semantics=("parallel",),   # v7x: shard batch steps across both TCs
        ),
        cost_estimate=cost,
    )(x, w1, b1, w2, b2, w3, b3)

    # Tiny slice + upcast (fused by XLA); only num_actions useful lanes.
    return out[:batch, :num_actions].astype(jnp.float32)


def init_actor_params(key, input_size, num_actions):
    """Deterministic init mimicking torch.nn.Linear default (U(-1/sqrt(fan_in), +1/sqrt(fan_in))).
    Weights are stored (in, out) so the kernel computes x @ W + b."""
    def linear(key, fan_in, fan_out):
        kw, kb = jax.random.split(key)
        bound = 1.0 / jnp.sqrt(float(fan_in))
        w = jax.random.uniform(kw, (fan_in, fan_out), jnp.float32, -bound, bound)
        b = jax.random.uniform(kb, (1, fan_out), jnp.float32, -bound, bound)
        return w, b

    k1, k2, k3 = jax.random.split(key, 3)
    w1, b1 = linear(k1, input_size, 64)
    w2, b2 = linear(k2, 64, 32)
    w3, b3 = linear(k3, 32, num_actions)
    return (w1, b1, w2, b2, w3, b3)


def actor_reference(x, params):
    """Pure-JAX f32 reference of the PyTorch forward pass."""
    w1, b1, w2, b2, w3, b3 = params
    h = jnp.maximum(x @ w1 + b1, 0.0)
    h = jnp.maximum(h @ w2 + b2, 0.0)
    return jnp.tanh(h @ w3 + b3)


if __name__ == "__main__":
    key = jax.random.PRNGKey(0)
    k_params, k_x1, k_x2 = jax.random.split(key, 3)

    input_size, num_actions = 16, 4
    params = init_actor_params(k_params, input_size, num_actions)
    padded_params = pad_actor_params(params)

    # Small batch: single grid step, no padding.
    batch = 64
    x = jax.random.normal(k_x1, (batch, input_size), jnp.float32)
    out = jax.block_until_ready(actor_forward(x, padded_params, num_actions))
    ref = actor_reference(x, params)
    assert out.shape == (batch, num_actions)
    assert jnp.allclose(out, ref, atol=2e-2, rtol=2e-2), "mismatch vs reference (batch=64)"

    # Ragged batch: exercises 2-step grid + zero-row padding path.
    batch2 = 300
    x2 = jax.random.normal(k_x2, (batch2, input_size), jnp.float32)
    out2 = jax.block_until_ready(actor_forward(x2, padded_params, num_actions))
    ref2 = actor_reference(x2, params)
    assert out2.shape == (batch2, num_actions)
    assert jnp.allclose(out2, ref2, atol=2e-2, rtol=2e-2), "mismatch vs reference (batch=300)"

    print("KERNEL_OK")
</pallas_src>

<mosaic_0001>
module attributes {stable_mosaic.version = 11 : i64} {
  func.func @actor_kernel(%arg0: i32, %arg1: memref<64x16xf32, #tpu.memory_space<vmem>>, %arg2: memref<16x128xf32, #tpu.memory_space<vmem>>, %arg3: memref<1x128xf32, #tpu.memory_space<vmem>>, %arg4: memref<128x128xbf16, #tpu.memory_space<vmem>>, %arg5: memref<1x128xf32, #tpu.memory_space<vmem>>, %arg6: memref<128x128xbf16, #tpu.memory_space<vmem>>, %arg7: memref<1x128xf32, #tpu.memory_space<vmem>>, %arg8: memref<64x128xbf16, #tpu.memory_space<vmem>>) attributes {dimension_semantics = [#tpu.dimension_semantics<parallel>], iteration_bounds = array<i64: 1>, scalar_prefetch = 0 : i64, scratch_operands = 0 : i64, tpu.core_type = #tpu.core_type<tc>, window_params = [{transform_indices = @transform_0, window_bounds = array<i64: 64, 16>}, {pipeline_mode = #tpu.pipeline_mode<synchronous>, transform_indices = @transform_1, window_bounds = array<i64: 16, 128>}, {pipeline_mode = #tpu.pipeline_mode<synchronous>, transform_indices = @transform_2, window_bounds = array<i64: 1, 128>}, {pipeline_mode = #tpu.pipeline_mode<synchronous>, transform_indices = @transform_3, window_bounds = array<i64: 128, 128>}, {pipeline_mode = #tpu.pipeline_mode<synchronous>, transform_indices = @transform_4, window_bounds = array<i64: 1, 128>}, {pipeline_mode = #tpu.pipeline_mode<synchronous>, transform_indices = @transform_5, window_bounds = array<i64: 128, 128>}, {pipeline_mode = #tpu.pipeline_mode<synchronous>, transform_indices = @transform_6, window_bounds = array<i64: 1, 128>}, {transform_indices = @transform_7, window_bounds = array<i64: 64, 128>}]} {
    %c0 = arith.constant 0 : index
    %c0_0 = arith.constant 0 : index
    %0 = vector.load %arg1[%c0, %c0_0] : memref<64x16xf32, #tpu.memory_space<vmem>>, vector<64x16xf32>
    %c0_1 = arith.constant 0 : index
    %c0_2 = arith.constant 0 : index
    %1 = vector.load %arg2[%c0_1, %c0_2] : memref<16x128xf32, #tpu.memory_space<vmem>>, vector<16x128xf32>
    %cst = arith.constant dense<0.000000e+00> : vector<64x128xf32>
    %2 = tpu.matmul %0, %1, %cst {dimension_numbers = #tpu.dot_dimension_numbers<[1], [0], [0], [1], [0, 0, 1, 1], [], []>} : vector<64x16xf32>, vector<16x128xf32>, vector<64x128xf32> -> vector<64x128xf32>
    %c0_3 = arith.constant 0 : index
    %c0_4 = arith.constant 0 : index
    %3 = vector.load %arg3[%c0_3, %c0_4] : memref<1x128xf32, #tpu.memory_space<vmem>>, vector<1x128xf32>
    %4 = vector.broadcast %3 : vector<1x128xf32> to vector<64x128xf32>
    %5 = arith.addf %2, %4 : vector<64x128xf32>
    %cst_5 = arith.constant 0.000000e+00 : f32
    %6 = vector.broadcast %cst_5 : f32 to vector<64x128xf32>
    %7 = arith.maximumf %5, %6 : vector<64x128xf32>
    %8 = arith.truncf %7 : vector<64x128xf32> to vector<64x128xbf16>
    %c0_6 = arith.constant 0 : index
    %c0_7 = arith.constant 0 : index
    %9 = vector.load %arg4[%c0_6, %c0_7] : memref<128x128xbf16, #tpu.memory_space<vmem>>, vector<128x128xbf16>
    %cst_8 = arith.constant dense<0.000000e+00> : vector<64x128xf32>
    %10 = tpu.matmul %8, %9, %cst_8 {dimension_numbers = #tpu.dot_dimension_numbers<[1], [0], [0], [1], [0, 0, 1, 1], [], []>} : vector<64x128xbf16>, vector<128x128xbf16>, vector<64x128xf32> -> vector<64x128xf32>
    %c0_9 = arith.constant 0 : index
    %c0_10 = arith.constant 0 : index
    %11 = vector.load %arg5[%c0_9, %c0_10] : memref<1x128xf32, #tpu.memory_space<vmem>>, vector<1x128xf32>
    %12 = vector.broadcast %11 : vector<1x128xf32> to vector<64x128xf32>
    %13 = arith.addf %10, %12 : vector<64x128xf32>
    %cst_11 = arith.constant 0.000000e+00 : f32
    %14 = vector.broadcast %cst_11 : f32 to vector<64x128xf32>
    %15 = arith.maximumf %13, %14 : vector<64x128xf32>
    %16 = arith.truncf %15 : vector<64x128xf32> to vector<64x128xbf16>
    %c0_12 = arith.constant 0 : index
    %c0_13 = arith.constant 0 : index
    %17 = vector.load %arg6[%c0_12, %c0_13] : memref<128x128xbf16, #tpu.memory_space<vmem>>, vector<128x128xbf16>
    %cst_14 = arith.constant dense<0.000000e+00> : vector<64x128xf32>
    %18 = tpu.matmul %16, %17, %cst_14 {dimension_numbers = #tpu.dot_dimension_numbers<[1], [0], [0], [1], [0, 0, 1, 1], [], []>} : vector<64x128xbf16>, vector<128x128xbf16>, vector<64x128xf32> -> vector<64x128xf32>
    %c0_15 = arith.constant 0 : index
    %c0_16 = arith.constant 0 : index
    %19 = vector.load %arg7[%c0_15, %c0_16] : memref<1x128xf32, #tpu.memory_space<vmem>>, vector<1x128xf32>
    %20 = vector.broadcast %19 : vector<1x128xf32> to vector<64x128xf32>
    %21 = arith.addf %18, %20 : vector<64x128xf32>
    %22 = math.tanh %21 : vector<64x128xf32>
    %23 = arith.truncf %22 : vector<64x128xf32> to vector<64x128xbf16>
    %c0_17 = arith.constant 0 : index
    %c0_18 = arith.constant 0 : index
    %24 = vector.load %arg8[%c0_17, %c0_18] : memref<64x128xbf16, #tpu.memory_space<vmem>>, vector<64x128xbf16>
    tpu.vector_store %arg8[%c0_17, %c0_18], %23 {strides = array<i32>} : memref<64x128xbf16, #tpu.memory_space<vmem>>, vector<64x128xbf16>,
    return
  }
  func.func @transform_0(%arg0: i32) -> (i32, i32) {
    %c0_i32 = arith.constant 0 : i32
    %c0_i32_0 = arith.constant 0 : i32
    return %arg0, %c0_i32 : i32, i32
  }
  func.func @transform_1(%arg0: i32) -> (i32, i32) {
    %c0_i32 = arith.constant 0 : i32
    %c0_i32_0 = arith.constant 0 : i32
    %c0_i32_1 = arith.constant 0 : i32
    return %c0_i32, %c0_i32_0 : i32, i32
  }
  func.func @transform_2(%arg0: i32) -> (i32, i32) {
    %c0_i32 = arith.constant 0 : i32
    %c0_i32_0 = arith.constant 0 : i32
    %c0_i32_1 = arith.constant 0 : i32
    return %c0_i32, %c0_i32_0 : i32, i32
  }
  func.func @transform_3(%arg0: i32) -> (i32, i32) {
    %c0_i32 = arith.constant 0 : i32
    %c0_i32_0 = arith.constant 0 : i32
    %c0_i32_1 = arith.constant 0 : i32
    return %c0_i32, %c0_i32_0 : i32, i32
  }
  func.func @transform_4(%arg0: i32) -> (i32, i32) {
    %c0_i32 = arith.constant 0 : i32
    %c0_i32_0 = arith.constant 0 : i32
    %c0_i32_1 = arith.constant 0 : i32
    return %c0_i32, %c0_i32_0 : i32, i32
  }
  func.func @transform_5(%arg0: i32) -> (i32, i32) {
    %c0_i32 = arith.constant 0 : i32
    %c0_i32_0 = arith.constant 0 : i32
    %c0_i32_1 = arith.constant 0 : i32
    return %c0_i32, %c0_i32_0 : i32, i32
  }
  func.func @transform_6(%arg0: i32) -> (i32, i32) {
    %c0_i32 = arith.constant 0 : i32
    %c0_i32_0 = arith.constant 0 : i32
    %c0_i32_1 = arith.constant 0 : i32
    return %c0_i32, %c0_i32_0 : i32, i32
  }
  func.func @transform_7(%arg0: i32) -> (i32, i32) {
    %c0_i32 = arith.constant 0 : i32
    %c0_i32_0 = arith.constant 0 : i32
    return %arg0, %c0_i32 : i32, i32
  }
}

</mosaic_0001>

<bundles_post_ra>
// kernel: tpu_custom_call.1
= control target key start
LH: loop header
LB: loop body
LE: loop exit
PB: predicated region body
PF: predicated region fallthrough
CT: control target
= control target key end

     0   :  { %12 = vsyncpa [#allocation3], 0  ;;  %s921_s0 = inlined_call_operand.vmem [shape: f32[64,16], index: 0, kind: input, shape index: {}]   ;;  %s922_s1 = inlined_call_operand.vmem [shape: f32[16,128], index: 1, kind: input, shape index: {}]   ;;  %s923_s2 = inlined_call_operand.vmem [shape: f32[1,128], index: 2, kind: input, shape index: {}]   ;;  %s924_s3 = inlined_call_operand.vmem [shape: bf16[128,128], index: 3, kind: input, shape index: {}]   ;;  %s925_s4 = inlined_call_operand.vmem [shape: f32[1,128], index: 4, kind: input, shape index: {}]   ;;  %s926_s5 = inlined_call_operand.hbm [shape: bf16[128,128], index: 5, kind: input, shape index: {}]   ;;  %s927_s6 = inlined_call_operand.vmem [shape: f32[1,128], index: 6, kind: input, shape index: {}]   ;;  %s928_s7 = inlined_call_operand.hbm [shape: bf16[64,128], index: 7, kind: output, shape index: {}]  }
   0x1   :  { %13 = vsyncpa [#allocation4], 0  ;;  %s794_s24 = smov [#allocation2]  }
   0x2   :  { %s29_s25 = sshll.u32 %s794_s24, 4  ;;  %s30_s25 = int_to_ptr.vmem [resolvable:$true] %s29_s25 }
   0x3   :  { %s758_s26 = scalar_lea.vmem %s30_s25, 1024  ;;  %p763_p1 = scmp.lt.s32.totalorder %s30_s25, %s30_s25 }
   0x4   :  { %p759_p0 = scmp.ne.s32.totalorder %s30_s25, %s758_s26  ;;  %p764_p2 = scmp.lt.s32.totalorder %s758_s26, %s758_s26 }
   0x6   :  { %p765_p3 = por %p764_p2, %p763_p1 }
   0x8   :  { %p766_p4 = pnand %p765_p3, %p759_p0 }
   0xa   :  { %769 = shalt.err (!%p766_p4)
}
   0xb   :  { %s795_s27 = smov 64   ;;  %s796_s28 = smov 4  }
   0xc   :  { %35 = dma.hbm_to_vmem [thread:$0]  %s926_s5, 1024, %s30_s25, [#allocation3], %s795_s27, %s795_s27, %s796_s28  }
   0xd   :  { %790 = dma.done.wait [#allocation3], 1024  }
   0xe   :  { %791 = vsyncadd [#allocation3], 4294966272  ;;  %vm59_vm0 = vcmask 130048   ;;  %v51_v0 = vld [vmem:[%s922_s1 + $0x8] sm:$0xff]  ;;  %v50_v1 = vld [vmem:[%s922_s1] sm:$0xff] }
   0xf   :  { %v42_v2 = vld [vmem:[%s921_s0] sm:$0xff]  ;;  %650 = vmatprep.subr.mxu0 %v51_v0  ;;  %v43_v3 = vld [vmem:[%s921_s0 + $0x8] sm:$0xff]  ;;  %v44_v4 = vld [vmem:[%s921_s0 + $0x10] sm:$0xff] }
  0x10   :  { %654 = vmatprep.mubr.msk.f32.mxu0 %vm59_vm0, %v42_v2  ;;  %651 = vmatpush3.msra.mxu0 %v51_v0  ;;  %v718_v5 = vld [vmem:[%s924_s3 + $0x38] sm:$0xff]   ;;  %v719_v6 = vld [vmem:[%s924_s3 + $0x30] sm:$0xff]   ;;  %v46_v8 = vld [vmem:[%s921_s0 + $0x20] sm:$0xff] }
  0x11   :  { %652 = vmatprep.subr.mxu0 %v50_v1  ;;  %v45_v7 = vld [vmem:[%s921_s0 + $0x18] sm:$0xff]  ;;  %666 = vmatprep.subr.bf16.mxu1 %v718_v5  ;;  %v47_v9 = vld [vmem:[%s921_s0 + $0x28] sm:$0xff]  ;;  %v48_v11 = vld [vmem:[%s921_s0 + $0x30] sm:$0xff] }
  0x12   :  { %653 = vmatpush3.msra.mxu0 %v50_v1  ;;  %667 = vmatpush3.bf16.msra.mxu1 %v718_v5  ;;  %v720_v10 = vld [vmem:[%s924_s3 + $0x28] sm:$0xff]   ;;  %v721_v12 = vld [vmem:[%s924_s3 + $0x20] sm:$0xff]   ;;  %v49_v13 = vld [vmem:[%s921_s0 + $0x38] sm:$0xff] }
  0x13   :  { %655 = vmatmul.mubr.msk.f32.vlgmr.msra.gmra.mxu0 %vm59_vm0, %v43_v3  ;;  %668 = vmatprep.subr.bf16.mxu1 %v719_v6  ;;  %v722_v14 = vld [vmem:[%s924_s3 + $0x18] sm:$0xff]   ;;  %v723_v15 = vld [vmem:[%s924_s3 + $0x10] sm:$0xff]   ;;  %v724_v16 = vld [vmem:[%s924_s3 + $0x8] sm:$0xff]  }
  0x14   :  { %657 = vmatprep.mubr.msk.f32.mxu0 %vm59_vm0, %v44_v4  ;;  %v725_v17 = vld [vmem:[%s924_s3] sm:$0xff]   ;;  %v726_v18 = vld [vmem:[#allocation2 + $0x38] sm:$0xff]   ;;  %v727_v19 = vld [vmem:[#allocation2 + $0x30] sm:$0xff]  }
  0x15   :  { %690 = vmatprep.subr.bf16.mxu0 %v726_v18  ;;  %v728_v20 = vld [vmem:[#allocation2 + $0x28] sm:$0xff]   ;;  %v729_v21 = vld [vmem:[#allocation2 + $0x20] sm:$0xff]   ;;  %v730_v22 = vld [vmem:[#allocation2 + $0x18] sm:$0xff]  }
  0x16   :  { %669 = vmatpush3.bf16.msra.mxu1 %v719_v6  ;;  %691 = vmatpush3.bf16.msra.mxu0 %v726_v18  ;;  %v550_v23 = vld [vmem:[%s923_s2] ss:$0 sm:$0xff]  ;;  %v731_v52 = vld [vmem:[#allocation2 + $0x10] sm:$0xff]   ;;  %v732_v53 = vld [vmem:[#allocation2 + $0x8] sm:$0xff]  }
  0x17   :  { %658 = vmatmul.mubr.msk.f32.gmra.mxu0 %vm59_vm0, %v45_v7  ;;  %670 = vmatprep.subr.bf16.mxu1 %v720_v10  ;;  %v733_v54 = vld [vmem:[#allocation2] sm:$0xff]  }
  0x18   :  { %660 = vmatprep.mubr.msk.f32.mxu0 %vm59_vm0, %v46_v8  ;;  %692 = vmatprep.subr.bf16.mxu0 %v727_v19  ;;  %v559_v57 = vld [vmem:[%s925_s4] ss:$0 sm:$0xff] }
  0x1a   :  { %671 = vmatpush3.bf16.msra.mxu1 %v720_v10  ;;  %693 = vmatpush3.bf16.msra.mxu0 %v727_v19 }
  0x1b   :  { %661 = vmatmul.mubr.msk.f32.gmra.mxu0 %vm59_vm0, %v47_v9  ;;  %672 = vmatprep.subr.bf16.mxu1 %v721_v12 }
  0x1c   :  { %663 = vmatprep.mubr.msk.f32.mxu0 %vm59_vm0, %v48_v11  ;;  %694 = vmatprep.subr.bf16.mxu0 %v728_v20 }
  0x1e   :  { %673 = vmatpush3.bf16.msra.mxu1 %v721_v12  ;;  %695 = vmatpush3.bf16.msra.mxu0 %v728_v20  ;;  %v568_v20 = vld [vmem:[%s927_s6] ss:$0 sm:$0xff]  ;;  %s797_s6 = smov [#allocation5]  }
  0x1f   :  { %664 = vmatmul.mubr.msk.f32.gmra.mxu0 %vm59_vm0, %v49_v13  ;;  %674 = vmatprep.subr.bf16.mxu1 %v722_v14  ;;  %s538_s21 = sshll.u32 %s797_s6, 4  ;;  %s539_s21 = int_to_ptr.vmem [resolvable:$true] %s538_s21 }
  0x20   :  { %696 = vmatprep.subr.bf16.mxu0 %v729_v21  ;;  %s770_s22 = scalar_lea.vmem %s539_s21, 512  ;;  %p775_p6 = scmp.lt.s32.totalorder %s539_s21, %s539_s21 }
  0x21   :  { %p771_p5 = scmp.ne.s32.totalorder %s539_s21, %s770_s22  ;;  %p776_p7 = scmp.lt.s32.totalorder %s770_s22, %s770_s22 }
  0x22   :  { %675 = vmatpush3.bf16.msra.mxu1 %v722_v14  ;;  %697 = vmatpush3.bf16.msra.mxu0 %v729_v21 }
  0x23   :  { %676 = vmatprep.subr.bf16.mxu1 %v723_v15  ;;  %698 = vmatprep.subr.bf16.mxu0 %v730_v22  ;;  %p777_p8 = por %p776_p7, %p775_p6 }
  0x25   :  { %p778_p9 = pnand %p777_p8, %p771_p5 }
  0x26   :  { %677 = vmatpush3.bf16.msra.mxu1 %v723_v15  ;;  %699 = vmatpush3.bf16.msra.mxu0 %v730_v22 }
  0x27   :  { %678 = vmatprep.subr.bf16.mxu1 %v724_v16  ;;  %700 = vmatprep.subr.bf16.mxu0 %v731_v52 }
  0x2a   :  { %679 = vmatpush3.bf16.msra.mxu1 %v724_v16  ;;  %701 = vmatpush3.bf16.msra.mxu0 %v731_v52 }
  0x2b   :  { %680 = vmatprep.subr.bf16.mxu1 %v725_v17  ;;  %702 = vmatprep.subr.bf16.mxu0 %v732_v53 }
  0x2e   :  { %681 = vmatpush3.bf16.msra.mxu1 %v725_v17  ;;  %703 = vmatpush3.bf16.msra.mxu0 %v732_v53 }
  0x2f   :  { %704 = vmatprep.subr.bf16.mxu0 %v733_v54 }
  0x32   :  { %705 = vmatpush3.bf16.msra.mxu0 %v733_v54 }
  0xd3   :  { %v656_v24 = vpop.f32.mrf.mxu0 }
  0xd4   :  { %v156_v25 = vadd.f32 %v656_v24, %v550_v23 }
  0xd5   :  { %v150_v26 = vpop.f32.mrf.mxu0 }
  0xd6   :  { %v151_v27 = vadd.f32 %v550_v23, %v150_v26  ;;  %v190_v29 = vmax.f32 %v156_v25, 0.0 }
  0xd7   :  { %v659_v28 = vpop.f32.mrf.mxu0 }
  0xd8   :  { %v189_v30 = vmax.f32 %v151_v27, 0.0  ;;  %v166_v31 = vadd.f32 %v659_v28, %v550_v23 }
  0xd9   :  { %v160_v32 = vpop.f32.mrf.mxu0 }
  0xda   :  { %v161_v33 = vadd.f32 %v550_v23, %v160_v32  ;;  %v197_v34 = vpack.c.bf16 %v190_v29, %v189_v30  ;;  %v192_v36 = vmax.f32 %v166_v31, 0.0 }
  0xdb   :  { %v662_v35 = vpop.f32.mrf.mxu0 }
  0xdc   :  { %v191_v37 = vmax.f32 %v161_v33, 0.0  ;;  %v176_v38 = vadd.f32 %v662_v35, %v550_v23  ;;  %682 = vmatprep.mubr.bf16.mxu1 %v197_v34 }
  0xdd   :  { %v170_v39 = vpop.f32.mrf.mxu0 }
  0xde   :  { %v198_v40 = vpack.c.bf16 %v192_v36, %v191_v37  ;;  %v171_v41 = vadd.f32 %v550_v23, %v170_v39  ;;  %v194_v43 = vmax.f32 %v176_v38, 0.0 }
  0xdf   :  { %v665_v42 = vpop.f32.mrf.mxu0 }
  0xe0   :  { %v193_v44 = vmax.f32 %v171_v41, 0.0  ;;  %v186_v45 = vadd.f32 %v665_v42, %v550_v23  ;;  %683 = vmatmul.mubr.bf16.vlgmr.msra.gmra.mxu1 %v198_v40 }
  0xe1   :  { %v180_v46 = vpop.f32.mrf.mxu0 }
  0xe2   :  { %v199_v47 = vpack.c.bf16 %v194_v43, %v193_v44  ;;  %v181_v48 = vadd.f32 %v550_v23, %v180_v46  ;;  %v196_v49 = vmax.f32 %v186_v45, 0.0 }
  0xe4   :  { %v195_v50 = vmax.f32 %v181_v48, 0.0  ;;  %686 = vmatprep.mubr.bf16.mxu1 %v199_v47 }
  0xe6   :  { %v200_v51 = vpack.c.bf16 %v196_v49, %v195_v50 }
  0xe8   :  { %687 = vmatmul.mubr.bf16.gmra.mxu1 %v200_v51 }
 0x1a0   :  { %v684_v55 = vpop.f32.mrf.mxu1 }
 0x1a1   :  { %v315_v61 = vadd.f32 %v684_v55, %v559_v57 }
 0x1a2   :  { %v306_v56 = vpop.f32.mrf.mxu1 }
 0x1a3   :  { %v307_v59 = vadd.f32 %v559_v57, %v306_v56  ;;  %v339_v4 = vmax.f32 %v315_v61, 0.0 }
 0x1a4   :  { %v685_v58 = vpop.f32.mrf.mxu1 }
 0x1a5   :  { %v318_v60 = vadd.f32 %v685_v58, %v559_v57  ;;  %v337_v2 = vmax.f32 %v307_v59, 0.0 }
 0x1a6   :  { %v309_v62 = vpop.f32.mrf.mxu1 }
 0x1a7   :  { %v310_v63 = vadd.f32 %v559_v57, %v309_v62  ;;  %v340_v0 = vmax.f32 %v318_v60, 0.0 }
 0x1a8   :  { %v688_v1 = vpop.f32.mrf.mxu1 }
 0x1a9   :  { %v338_v3 = vmax.f32 %v310_v63, 0.0  ;;  %v346_v7 = vpack.c.bf16 %v340_v0, %v339_v4  ;;  %v331_v11 = vadd.f32 %v688_v1, %v559_v57 }
 0x1aa   :  { %v322_v5 = vpop.f32.mrf.mxu1 }
 0x1ab   :  { %v345_v6 = vpack.c.bf16 %v338_v3, %v337_v2  ;;  %v323_v9 = vadd.f32 %v559_v57, %v322_v5  ;;  %v343_v17 = vmax.f32 %v331_v11, 0.0 }
 0x1ac   :  { %v689_v8 = vpop.f32.mrf.mxu1 }
 0x1ad   :  { %v334_v10 = vadd.f32 %v689_v8, %v559_v57  ;;  %706 = vmatprep.mubr.bf16.mxu0 %v345_v6  ;;  %v341_v15 = vmax.f32 %v323_v9, 0.0 }
 0x1ae   :  { %v325_v12 = vpop.f32.mrf.mxu1  ;;  %707 = vmatmul.mubr.bf16.vlgmr.msra.gmra.mxu0 %v346_v7 }
 0x1af   :  { %v326_v13 = vadd.f32 %v559_v57, %v325_v12  ;;  %v344_v14 = vmax.f32 %v334_v10, 0.0 }
 0x1b1   :  { %v342_v16 = vmax.f32 %v326_v13, 0.0  ;;  %v348_v19 = vpack.c.bf16 %v344_v14, %v343_v17 }
 0x1b3   :  { %v347_v18 = vpack.c.bf16 %v342_v16, %v341_v15 }
 0x1b5   :  { %710 = vmatprep.mubr.bf16.mxu0 %v347_v18 }
 0x1b6   :  { %711 = vmatmul.mubr.bf16.gmra.mxu0 %v348_v19 }
 0x26e   :  { %v708_v21 = vpop.f32.mrf.mxu0 }
 0x26f   :  { %v463_v22 = vadd.f32 %v708_v21, %v568_v20 }
 0x270   :  { %v454_v23 = vpop.f32.mrf.mxu0 }
 0x271   :  { %v455_v24 = vadd.f32 %v568_v20, %v454_v23  ;;  %734 = vtanh.f32 %v463_v22 }
 0x272   :  { %v709_v25 = vpop.f32.mrf.mxu0 }
 0x273   :  { %v466_v26 = vadd.f32 %v709_v25, %v568_v20 }
 0x274   :  { %v457_v27 = vpop.f32.mrf.mxu0 }
 0x275   :  { %736 = vtanh.f32 %v466_v26  ;;  %v458_v28 = vadd.f32 %v568_v20, %v457_v27 }
 0x276   :  { %738 = vtanh.f32 %v455_v24  ;;  %v712_v29 = vpop.f32.mrf.mxu0 }
 0x277   :  { %740 = vtanh.f32 %v458_v28  ;;  %v479_v30 = vadd.f32 %v712_v29, %v568_v20 }
 0x278   :  { %v470_v31 = vpop.f32.mrf.mxu0 }
 0x279   :  { %v471_v32 = vadd.f32 %v568_v20, %v470_v31  ;;  %742 = vtanh.f32 %v479_v30 }
 0x27a   :  { %v713_v33 = vpop.f32.mrf.mxu0 }
 0x27b   :  { %v482_v34 = vadd.f32 %v713_v33, %v568_v20 }
 0x27c   :  { %v473_v35 = vpop.f32.mrf.mxu0 }
 0x27d   :  { %744 = vtanh.f32 %v482_v34  ;;  %v474_v36 = vadd.f32 %v568_v20, %v473_v35 }
 0x27e   :  { %746 = vtanh.f32 %v471_v32  ;;  %v735_v37 = vpop.eup %734 }
 0x27f   :  { %748 = vtanh.f32 %v474_v36 }
 0x282   :  { %v737_v38 = vpop.eup %736 }
 0x283   :  { %v739_v39 = vpop.eup %738  ;;  %v601_v40 = vpack.c.bf16 %v737_v38, %v735_v37 }
 0x284   :  { %v741_v41 = vpop.eup %740 }
 0x285   :  { %v596_v42 = vpack.c.bf16 %v741_v41, %v739_v39  ;;  %613 = vst [vmem:[#allocation5 + $0x8] sm:$0xff] %v601_v40  }
 0x286   :  { %v743_v43 = vpop.eup %742 }
 0x287   :  { %597 = vst [vmem:[#allocation5] sm:$0xff] %v596_v42  }
 0x28a   :  { %v745_v44 = vpop.eup %744 }
 0x28b   :  { %v747_v45 = vpop.eup %746  ;;  %v611_v46 = vpack.c.bf16 %v745_v44, %v743_v43 }
 0x28c   :  { %v749_v47 = vpop.eup %748 }
 0x28d   :  { %v606_v48 = vpack.c.bf16 %v749_v47, %v747_v45  ;;  %615 = vst [vmem:[#allocation5 + $0x18] sm:$0xff] %v611_v46  }
 0x28f   :  { %614 = vst [vmem:[#allocation5 + $0x10] sm:$0xff] %v606_v48  }
 0x290   :  { %781 = shalt.err (!%p778_p9)
}
 0x291   :  { %544 = dma.vmem_to_hbm [thread:$0]  %s539_s21, 512, %s928_s7, [#allocation4], %s795_s27, %s795_s27, %s796_s28  }
 0x292   :  { %792 = dma.done.wait [#allocation4], 512  }
 0x293   :  { %793 = vsyncadd [#allocation4], 4294966784 }
 0x294   :  { %548 = vsyncpa [#allocation3], 1 }
 0x295   :  { %549 = vsyncpa [#allocation4], 1 }

</bundles_post_ra>
